<compile_context>
chip_gen: v7x
topology: tpu7x:2x2x1
jax: 0.10.0
libtpu: 0.0.40
codegen_flags: <defaults>
</compile_context>

<pallas_src>
import math

import jax
import jax.numpy as jnp
from jax.experimental import pallas as pl
from jax.experimental.pallas import tpu as pltpu


# ----------------------------------------------------------------------------
# Pallas kernel: fused  y = relu(x @ W + b)
#   * grid-less: each operand is one resident VMEM block (x 8 KiB, W 64 KiB
#     bf16, b 128 B) -- far under any chip's VMEM, no pipeline bookkeeping.
#   * x cast to bf16 in-vreg (no-op if already bf16); f32 MXU accumulation.
# ----------------------------------------------------------------------------
def _linear_relu_kernel(x_ref, w_ref, b_ref, o_ref):
    x = x_ref[...].astype(jnp.bfloat16)
    y = jnp.dot(x, w_ref[...], preferred_element_type=jnp.float32)
    o_ref[...] = jnp.maximum(y + b_ref[...], 0.0).astype(o_ref.dtype)


def linear_relu_pallas(x2d, w_bf16, b2d):
    """x2d: [N, D] (f32 or bf16), w_bf16: [D, H] bf16, b2d: [1, H] f32
    -> [N, H] f32."""
    n = x2d.shape[0]
    h = w_bf16.shape[1]
    return pl.pallas_call(
        _linear_relu_kernel,
        out_shape=jax.ShapeDtypeStruct((n, h), jnp.float32),
        in_specs=[
            pl.BlockSpec(memory_space=pltpu.MemorySpace.VMEM),
            pl.BlockSpec(memory_space=pltpu.MemorySpace.VMEM),
            pl.BlockSpec(memory_space=pltpu.MemorySpace.VMEM),
        ],
        out_specs=pl.BlockSpec(memory_space=pltpu.MemorySpace.VMEM),
    )(x2d, w_bf16, b2d)


# ----------------------------------------------------------------------------
# Synthetic inner model (Flatten -> Linear -> ReLU), params built in-script
# ----------------------------------------------------------------------------
class InnerModel:
    """Row-independent inner model, so the wrapper's dummy padding collapses
    to prepending n_lead dummy rows (handled in MyModelPallas.forward)."""

    row_independent = True

    def __init__(self, key, in_features, hidden):
        kw, kb = jax.random.split(key)
        scale = 1.0 / math.sqrt(in_features)
        # f32 master copies (used by the reference check)
        self.w = jax.random.uniform(
            kw, (in_features, hidden), jnp.float32, -scale, scale)
        self.b = jax.random.uniform(
            kb, (1, hidden), jnp.float32, -scale, scale)
        self.hidden = hidden
        # Kernel-side weight: bf16 and NOT lane-padded (HIDDEN stays 32):
        # W dominates HBM traffic, padding 32 -> 128 quadrupled it for free.
        self.w_bf16 = self.w.astype(jnp.bfloat16)
        # TODO(synk): on v7x, fp8 weight storage would halve this DMA again
        # (f32 accumulation unchanged); on v6e use int8/int4 instead.

    def __call__(self, x, dummy_bs=0, n_lead_dummy=0):
        # x: [N, C, H, W] -> flatten row-major like torch .view(N, -1)
        n = x.shape[0]
        x2d = x.reshape(n, -1)
        if n_lead_dummy:
            # Single fused pad + cast: `n_lead_dummy` leading zero rows
            # reproduce the wrapper's dummy rows (a zero row yields relu(b),
            # exactly what the original computes on a dummy row); writing the
            # padded copy in bf16 halves its HBM traffic.
            x2d = jnp.pad(x2d, ((n_lead_dummy, 0), (0, 0))).astype(jnp.bfloat16)
        return linear_relu_pallas(x2d, self.w_bf16, self.b)


# ----------------------------------------------------------------------------
# myModel: batch-padding DataParallel wrapper, forward semantics reproduced
# ----------------------------------------------------------------------------
class MyModelPallas:
    """Original semantics:
         inputs  = add_dummy_to_tensor(inputs, pad_bs)      # pad_bs zero rows
         outputs = model(*inputs, dummy_bs=pad_bs)
         if pad_bs == bs_per_gpu: outputs = remove_dummy_from_tensor(outputs, 1)
       For a row-independent inner model this is exactly: prepend
       n_lead = min(pad_bs, N) - (pad_bs == bs_per_gpu) dummy output rows,
       produced from fused zero rows -- no separate HBM pad / strip copies."""

    def __init__(self, opt, model):
        self.opt = opt
        self.module = model
        self.model = model  # no DataParallel: the TPU grid is a serial loop
        self.bs_per_gpu = int(
            math.ceil(float(opt["batchSize"]) / len(opt["gpu_ids"])))
        self.pad_bs = self.bs_per_gpu * len(opt["gpu_ids"]) - opt["batchSize"]

    def forward(self, *inputs, **kwargs):
        strip = 1 if self.pad_bs == self.bs_per_gpu else 0
        if getattr(self.model, "row_independent", False):
            n = inputs[0].shape[0]
            # zeros_like(t)[:add_size] adds at most N rows (PyTorch quirk).
            eff_pad = min(self.pad_bs, n)
            n_lead = eff_pad - strip
            return self.model(*inputs, **kwargs, dummy_bs=self.pad_bs,
                              n_lead_dummy=n_lead)
        # Generic fallback (needed only if the inner model mixes batch rows,
        # e.g. batch-norm): literal pad / strip, same as the PyTorch wrapper.
        inputs = self.add_dummy_to_tensor(inputs, self.pad_bs)
        outputs = self.model(*inputs, **kwargs, dummy_bs=self.pad_bs)
        if strip:
            return self.remove_dummy_from_tensor(outputs, 1)
        return outputs

    def add_dummy_to_tensor(self, tensors, add_size=0):
        if add_size == 0 or tensors is None:
            return tensors
        if isinstance(tensors, (list, tuple)):
            return [self.add_dummy_to_tensor(t, add_size) for t in tensors]
        if isinstance(tensors, jnp.ndarray):
            # NOTE: like the original, this silently adds min(add_size, N) rows.
            dummy = jnp.zeros_like(tensors)[:add_size]
            tensors = jnp.concatenate([dummy, tensors], axis=0)
        return tensors

    def remove_dummy_from_tensor(self, tensors, remove_size=0):
        if remove_size == 0 or tensors is None:
            return tensors
        if isinstance(tensors, (list, tuple)):
            return [self.remove_dummy_from_tensor(t, remove_size)
                    for t in tensors]
        if isinstance(tensors, jnp.ndarray):
            tensors = tensors[remove_size:]
        return tensors


# ----------------------------------------------------------------------------
# main
# ----------------------------------------------------------------------------
if __name__ == "__main__":
    key = jax.random.PRNGKey(0)
    k_x, k_params = jax.random.split(key)

    # Small shapes consistent with an NCHW image-model input.
    N, C, H, W = 2, 4, 16, 16
    HIDDEN = 32

    x = jax.random.normal(k_x, (N, C, H, W), jnp.float32)
    inner = InnerModel(k_params, in_features=C * H * W, hidden=HIDDEN)

    # Reference for the real rows: identical bf16-operand / f32-accumulate math.
    x2d_bf = x.reshape(N, -1).astype(jnp.bfloat16)
    ref_real = jnp.maximum(
        jnp.dot(x2d_bf, inner.w.astype(jnp.bfloat16),
                preferred_element_type=jnp.float32) + inner.b, 0.0)

    # --- Config 1: batchSize=2, 3 "GPUs" -> bs_per_gpu=1, pad_bs=1 == bs_per_gpu
    # The original pads one dummy row and strips one output row; the fused path
    # computes the identical result with zero padding work (n_lead = 0).
    opt1 = {"batchSize": N, "gpu_ids": [0, 1, 2]}
    model1 = MyModelPallas(opt1, inner)
    out1 = jax.jit(lambda xx: model1.forward(xx))(x)
    out1 = out1[0] if isinstance(out1, (list, tuple)) else out1
    out1 = jax.block_until_ready(out1)
    assert out1.shape == (N, HIDDEN), out1.shape
    assert jnp.allclose(out1, ref_real, atol=1e-2, rtol=1e-2), \
        float(jnp.max(jnp.abs(out1 - ref_real)))

    # --- Config 2: batchSize=2, 4 "GPUs" -> bs_per_gpu=1, pad_bs=2 != bs_per_gpu
    # No strip: output keeps 2 leading dummy rows, each equal to relu(b).
    opt2 = {"batchSize": N, "gpu_ids": [0, 1, 2, 3]}
    model2 = MyModelPallas(opt2, inner)
    out2 = jax.jit(lambda xx: model2.forward(xx))(x)
    out2 = out2[0] if isinstance(out2, (list, tuple)) else out2
    out2 = jax.block_until_ready(out2)
    ref_dummy = jnp.broadcast_to(jnp.maximum(inner.b, 0.0), (2, HIDDEN))
    ref2 = jnp.concatenate([ref_dummy, ref_real], axis=0)
    assert out2.shape == (N + 2, HIDDEN), out2.shape
    assert jnp.allclose(out2, ref2, atol=1e-2, rtol=1e-2), \
        float(jnp.max(jnp.abs(out2 - ref2)))

    print("KERNEL_OK")
</pallas_src>

<mosaic_0001>
module attributes {stable_mosaic.version = 11 : i64} {
  func.func @_linear_relu_kernel(%arg0: memref<2x1024xf32, #tpu.memory_space<vmem>>, %arg1: memref<1024x32xbf16, #tpu.memory_space<vmem>>, %arg2: memref<1x32xf32, #tpu.memory_space<vmem>>, %arg3: memref<2x32xf32, #tpu.memory_space<vmem>>) attributes {dimension_semantics = [], scalar_prefetch = 0 : i64, scratch_operands = 0 : i64, tpu.core_type = #tpu.core_type<tc>} {
    %c0 = arith.constant 0 : index
    %c0_0 = arith.constant 0 : index
    %0 = vector.load %arg0[%c0, %c0_0] : memref<2x1024xf32, #tpu.memory_space<vmem>>, vector<2x1024xf32>
    %1 = arith.truncf %0 : vector<2x1024xf32> to vector<2x1024xbf16>
    %c0_1 = arith.constant 0 : index
    %c0_2 = arith.constant 0 : index
    %2 = vector.load %arg1[%c0_1, %c0_2] : memref<1024x32xbf16, #tpu.memory_space<vmem>>, vector<1024x32xbf16>
    %cst = arith.constant dense<0.000000e+00> : vector<2x32xf32>
    %3 = tpu.matmul %1, %2, %cst {dimension_numbers = #tpu.dot_dimension_numbers<[1], [0], [0], [1], [0, 0, 1, 1], [], []>} : vector<2x1024xbf16>, vector<1024x32xbf16>, vector<2x32xf32> -> vector<2x32xf32>
    %c0_3 = arith.constant 0 : index
    %c0_4 = arith.constant 0 : index
    %4 = vector.load %arg2[%c0_3, %c0_4] : memref<1x32xf32, #tpu.memory_space<vmem>>, vector<1x32xf32>
    %5 = vector.broadcast %4 : vector<1x32xf32> to vector<2x32xf32>
    %6 = arith.addf %3, %5 : vector<2x32xf32>
    %cst_5 = arith.constant 0.000000e+00 : f32
    %7 = vector.broadcast %cst_5 : f32 to vector<2x32xf32>
    %8 = arith.maximumf %6, %7 : vector<2x32xf32>
    %c0_6 = arith.constant 0 : index
    %c0_7 = arith.constant 0 : index
    %9 = vector.load %arg3[%c0_6, %c0_7] : memref<2x32xf32, #tpu.memory_space<vmem>>, vector<2x32xf32>
    tpu.vector_store %arg3[%c0_6, %c0_7], %8 {strides = array<i32>} : memref<2x32xf32, #tpu.memory_space<vmem>>, vector<2x32xf32>,
    return
  }
}

</mosaic_0001>

<bundles_post_ra>
// kernel: _lambda_.1
= control target key start
LH: loop header
LB: loop body
LE: loop exit
PB: predicated region body
PF: predicated region fallthrough
CT: control target
= control target key end

     0   :  { %8 = vsyncpa [#allocation3], 0  ;;  %s1117_s0 = inlined_call_operand.vmem [shape: f32[2,1024], index: 0, kind: input, shape index: {}]   ;;  %s1118_s1 = inlined_call_operand.hbm [shape: bf16[1024,32], index: 1, kind: input, shape index: {}]   ;;  %s1119_s2 = inlined_call_operand.vmem [shape: f32[1,32], index: 2, kind: input, shape index: {}]   ;;  %s1120_s3 = inlined_call_operand.hbm [shape: f32[2,32], index: 3, kind: output, shape index: {}]  }
   0x1   :  { %9 = vsyncpa [#allocation4], 0  ;;  %s1053_s12 = smov [#allocation2]   ;;  %s1005_s16 = scalar_lea.hbm %s1118_s1, 8192 }
   0x2   :  { %s17_s13 = sshll.u32 %s1053_s12, 4  ;;  %p1006_p0 = scmp.ne.s32.totalorder %s1118_s1, %s1005_s16  ;;  %s18_s13 = int_to_ptr.vmem [resolvable:$true] %s17_s13 }
   0x3   :  { %p1009_p1 = scmp.lt.u32.totalorder %s1005_s16, %s1118_s1 }
   0x5   :  { %p1011_p2 = pnand %p1009_p1, %p1006_p0 }
   0x7   :  { %1014 = shalt.err (!%p1011_p2)
}
   0x8   :  { %s1015_s21 = scalar_lea.vmem %s18_s13, 8192  ;;  %p1020_p4 = scmp.lt.s32.totalorder %s18_s13, %s18_s13 }
   0x9   :  { %p1016_p3 = scmp.ne.s32.totalorder %s18_s13, %s1015_s21  ;;  %p1021_p5 = scmp.lt.s32.totalorder %s1015_s21, %s1015_s21 }
   0xb   :  { %p1022_p6 = por %p1021_p5, %p1020_p4 }
   0xd   :  { %p1023_p7 = pnand %p1022_p6, %p1016_p3 }
   0xf   :  { %1026 = shalt.err (!%p1023_p7)
}
  0x10   :  { %s1054_s22 = smov 64   ;;  %s1055_s23 = smov 4  }
  0x11   :  { %23 = dma.hbm_to_vmem [thread:$0]  %s1118_s1, 8192, %s18_s13, [#allocation3], %s1054_s22, %s1054_s22, %s1055_s23  }
  0x12   :  { %1049 = dma.done.wait [#allocation3], 8192  }
  0x13   :  { %1050 = vsyncadd [#allocation3], 4294959104  ;;  %v939_v0 = vld [vmem:[#allocation2 + $0x40] sm:$0xff]   ;;  %v943_v4 = vld [vmem:[#allocation2 + $0x48] sm:$0xff]   ;;  %v1056_v22 = vmov 1983009808   ;;  %v38_v24 = vlaneseq }
  0x14   :  { %v940_v1 = vld [vmem:[#allocation2 + $0xc0] sm:$0xff]   ;;  %846 = vmatprep.subr.bf16.mxu0 %v939_v0  ;;  %v944_v5 = vld [vmem:[#allocation2 + $0xc8] sm:$0xff]   ;;  %v947_v8 = vld [vmem:[#allocation2 + $0x50] sm:$0xff]   ;;  %v36_v23 = vunpack.c.l.s4 %v1056_v22  ;;  %vm764_vm0 = vcmask 254976  }
  0x15   :  { %v941_v2 = vld [vmem:[#allocation2] sm:$0xff]   ;;  %868 = vmatprep.subr.bf16.mxu1 %v940_v1  ;;  %v945_v6 = vld [vmem:[#allocation2 + $0x8] sm:$0xff]   ;;  %v948_v9 = vld [vmem:[#allocation2 + $0xd0] sm:$0xff]   ;;  %v39_v30 = vshrl.u32 %v38_v24, 7 }
  0x16   :  { %v942_v3 = vld [vmem:[#allocation2 + $0x80] sm:$0xff]   ;;  %847 = vmatpush3.bf16.msra.mxu0 %v941_v2  ;;  %v946_v7 = vld [vmem:[#allocation2 + $0x88] sm:$0xff]   ;;  %v949_v10 = vld [vmem:[#allocation2 + $0x10] sm:$0xff]   ;;  %v37_v29 = vunpack.c.0.s8 %v36_v23 }
  0x17   :  { %869 = vmatpush3.bf16.msra.mxu1 %v942_v3  ;;  %848 = vmatprep.subr.bf16.mxu0 %v943_v4  ;;  %v950_v11 = vld [vmem:[#allocation2 + $0x90] sm:$0xff]   ;;  %v951_v12 = vld [vmem:[#allocation2 + $0x58] sm:$0xff]   ;;  %v955_v16 = vld [vmem:[#allocation2 + $0x60] sm:$0xff]  }
  0x18   :  { %870 = vmatprep.subr.bf16.mxu1 %v944_v5  ;;  %v952_v13 = vld [vmem:[#allocation2 + $0xd8] sm:$0xff]   ;;  %v956_v17 = vld [vmem:[#allocation2 + $0xe0] sm:$0xff]   ;;  %v959_v20 = vld [vmem:[#allocation2 + $0x68] sm:$0xff]   ;;  %v1090_v35 = vsub.s32 %v37_v29, %v39_v30 }
  0x19   :  { %v953_v14 = vld [vmem:[#allocation2 + $0x18] sm:$0xff]   ;;  %v957_v18 = vld [vmem:[#allocation2 + $0x20] sm:$0xff]   ;;  %v960_v21 = vld [vmem:[#allocation2 + $0xe8] sm:$0xff]  }
  0x1a   :  { %849 = vmatpush3.bf16.msra.mxu0 %v945_v6  ;;  %v954_v15 = vld [vmem:[#allocation2 + $0x98] sm:$0xff]   ;;  %v958_v19 = vld [vmem:[#allocation2 + $0xa0] sm:$0xff]   ;;  %v961_v25 = vld [vmem:[#allocation2 + $0x28] sm:$0xff]  }
  0x1b   :  { %871 = vmatpush3.bf16.msra.mxu1 %v946_v7  ;;  %850 = vmatprep.subr.bf16.mxu0 %v947_v8  ;;  %v962_v26 = vld [vmem:[#allocation2 + $0xa8] sm:$0xff]   ;;  %v963_v27 = vld [vmem:[#allocation2 + $0x70] sm:$0xff]   ;;  %v967_v33 = vld [vmem:[#allocation2 + $0x78] sm:$0xff]  }
  0x1c   :  { %872 = vmatprep.subr.bf16.mxu1 %v948_v9  ;;  %v964_v28 = vld [vmem:[#allocation2 + $0xf0] sm:$0xff]   ;;  %v968_v34 = vld [vmem:[#allocation2 + $0xf8] sm:$0xff]   ;;  %v30_v38 = vld [vmem:[%s1117_s0] sm:$0xff] }
  0x1d   :  { %v965_v31 = vld [vmem:[#allocation2 + $0x30] sm:$0xff]   ;;  %v969_v36 = vld [vmem:[#allocation2 + $0x38] sm:$0xff]   ;;  %v41_v39 = vrot.slane %v30_v38, %v1090_v35  ;;  %v34_v40 = vcombine.high %v30_v38, %v30_v38  ;;  %v972_v41 = vld [vmem:[#allocation2 + $0x140] sm:$0xff]  }
  0x1e   :  { %851 = vmatpush3.bf16.msra.mxu0 %v949_v10  ;;  %v966_v32 = vld [vmem:[#allocation2 + $0xb0] sm:$0xff]   ;;  %v970_v37 = vld [vmem:[#allocation2 + $0xb8] sm:$0xff]   ;;  %v973_v42 = vld [vmem:[#allocation2 + $0x1c0] sm:$0xff]  }
  0x1f   :  { %873 = vmatpush3.bf16.msra.mxu1 %v950_v11  ;;  %852 = vmatprep.subr.bf16.mxu0 %v951_v12  ;;  %v49_v43 = vcombine.high %v41_v39, %v41_v39  ;;  %v48_v44 = vrot.slane %v34_v40, %v1090_v35  ;;  %v76_v45 = vpack.c.bf16 %v41_v39, %v41_v39  ;;  %v974_v48 = vld [vmem:[#allocation2 + $0x100] sm:$0xff]   ;;  %v976_v50 = vld [vmem:[#allocation2 + $0x148] sm:$0xff]   ;;  %v980_v55 = vld [vmem:[#allocation2 + $0x150] sm:$0xff]  }
  0x20   :  { %874 = vmatprep.subr.bf16.mxu1 %v952_v13  ;;  %v975_v52 = vld [vmem:[#allocation2 + $0x180] sm:$0xff]   ;;  %v977_v53 = vld [vmem:[#allocation2 + $0x1c8] sm:$0xff]   ;;  %v981_v57 = vld [vmem:[#allocation2 + $0x1d0] sm:$0xff]  }
  0x21   :  { %v77_v46 = vpack.c.bf16 %v49_v43, %v49_v43  ;;  %v50_v47 = vcombine.high %v48_v44, %v48_v44  ;;  %v78_v49 = vpack.c.bf16 %v48_v44, %v48_v44  ;;  %v978_v54 = vld [vmem:[#allocation2 + $0x108] sm:$0xff]   ;;  %v982_v58 = vld [vmem:[#allocation2 + $0x110] sm:$0xff]   ;;  %v984_v59 = vld [vmem:[#allocation2 + $0x158] sm:$0xff]  }
  0x22   :  { %853 = vmatpush3.bf16.msra.mxu0 %v953_v14  ;;  %v979_v56 = vld [vmem:[#allocation2 + $0x188] sm:$0xff]   ;;  %v983_v60 = vld [vmem:[#allocation2 + $0x190] sm:$0xff]   ;;  %v985_v61 = vld [vmem:[#allocation2 + $0x1d8] sm:$0xff]  }
  0x23   :  { %875 = vmatpush3.bf16.msra.mxu1 %v954_v15  ;;  %854 = vmatprep.subr.bf16.mxu0 %v955_v16  ;;  %v79_v51 = vpack.c.bf16 %v50_v47, %v50_v47  ;;  %v986_v62 = vld [vmem:[#allocation2 + $0x118] sm:$0xff]   ;;  %v988_v63 = vld [vmem:[#allocation2 + $0x160] sm:$0xff]   ;;  %v992_v3 = vld [vmem:[#allocation2 + $0x168] sm:$0xff]  }
  0x24   :  { %876 = vmatprep.subr.bf16.mxu1 %v956_v17  ;;  %635 = vmatprep.mubr.bf16.mxu0 %v77_v46  ;;  %v987_v0 = vld [vmem:[#allocation2 + $0x198] sm:$0xff]   ;;  %v989_v1 = vld [vmem:[#allocation2 + $0x1e0] sm:$0xff]   ;;  %v993_v5 = vld [vmem:[#allocation2 + $0x1e8] sm:$0xff]  }
  0x25   :  { %675 = vmatprep.mubr.bf16.mxu1 %v79_v51  ;;  %v990_v2 = vld [vmem:[#allocation2 + $0x120] sm:$0xff]   ;;  %v994_v6 = vld [vmem:[#allocation2 + $0x128] sm:$0xff]   ;;  %v996_v7 = vld [vmem:[#allocation2 + $0x170] sm:$0xff]  }
  0x26   :  { %855 = vmatpush3.bf16.msra.mxu0 %v957_v18  ;;  %v991_v4 = vld [vmem:[#allocation2 + $0x1a0] sm:$0xff]   ;;  %v995_v8 = vld [vmem:[#allocation2 + $0x1a8] sm:$0xff]   ;;  %v997_v9 = vld [vmem:[#allocation2 + $0x1f0] sm:$0xff]  }
  0x27   :  { %877 = vmatpush3.bf16.msra.mxu1 %v958_v19  ;;  %856 = vmatprep.subr.bf16.mxu0 %v959_v20  ;;  %v998_v10 = vld [vmem:[#allocation2 + $0x130] sm:$0xff]   ;;  %v1000_v11 = vld [vmem:[#allocation2 + $0x178] sm:$0xff]   ;;  %v31_v14 = vld [vmem:[%s1117_s0 + $0x8] sm:$0xff] }
  0x28   :  { %878 = vmatprep.subr.bf16.mxu1 %v960_v21  ;;  %v999_v12 = vld [vmem:[#allocation2 + $0x1b0] sm:$0xff]   ;;  %v1001_v13 = vld [vmem:[#allocation2 + $0x1f8] sm:$0xff]   ;;  %v58_v16 = vrot.slane %v31_v14, %v1090_v35  ;;  %v51_v17 = vcombine.high %v31_v14, %v31_v14 }
  0x29   :  { %v1002_v15 = vld [vmem:[#allocation2 + $0x138] sm:$0xff]  }
  0x2a   :  { %857 = vmatpush3.bf16.msra.mxu0 %v961_v25  ;;  %v1003_v18 = vld [vmem:[#allocation2 + $0x1b8] sm:$0xff]   ;;  %v66_v19 = vcombine.high %v58_v16, %v58_v16  ;;  %v65_v20 = vrot.slane %v51_v17, %v1090_v35  ;;  %v80_v21 = vpack.c.bf16 %v58_v16, %v58_v16 }
  0x2b   :  { %879 = vmatpush3.bf16.msra.mxu1 %v962_v26  ;;  %858 = vmatprep.subr.bf16.mxu0 %v963_v27  ;;  %v781_v27 = vld [vmem:[%s1119_s2] ss:$0 sm:$0xff]  ;;  %s1057_s2 = smov [#allocation5]  }
  0x2c   :  { %880 = vmatprep.subr.bf16.mxu1 %v964_v28  ;;  %v81_v22 = vpack.c.bf16 %v66_v19, %v66_v19  ;;  %v67_v23 = vcombine.high %v65_v20, %v65_v20  ;;  %v82_v24 = vpack.c.bf16 %v65_v20, %v65_v20  ;;  %s772_s30 = sshll.u32 %s1057_s2, 4  ;;  %s773_s30 = int_to_ptr.vmem [resolvable:$true] %s772_s30 }
  0x2d   :  { %s1027_s4 = scalar_lea.vmem %s773_s30, 32  ;;  %p1032_p9 = scmp.lt.s32.totalorder %s773_s30, %s773_s30 }
  0x2e   :  { %859 = vmatpush3.bf16.msra.mxu0 %v965_v31  ;;  %v83_v25 = vpack.c.bf16 %v67_v23, %v67_v23  ;;  %p1028_p8 = scmp.ne.s32.totalorder %s773_s30, %s1027_s4  ;;  %p1033_p10 = scmp.lt.s32.totalorder %s1027_s4, %s1027_s4 }
  0x2f   :  { %881 = vmatpush3.bf16.msra.mxu1 %v966_v32  ;;  %860 = vmatprep.subr.bf16.mxu0 %v967_v33 }
  0x30   :  { %882 = vmatprep.subr.bf16.mxu1 %v968_v34  ;;  %p1034_p11 = por %p1033_p10, %p1032_p9 }
  0x32   :  { %861 = vmatpush3.bf16.msra.mxu0 %v969_v36  ;;  %p1035_p12 = pnand %p1034_p11, %p1028_p8 }
  0x33   :  { %883 = vmatpush3.bf16.msra.mxu1 %v970_v37  ;;  %890 = vmatprep.subr.bf16.mxu0 %v972_v41 }
  0x34   :  { %912 = vmatprep.subr.bf16.mxu1 %v973_v42 }
  0x35   :  { %636 = vmatmul.mubr.bf16.vlgmr.msra.gmra.mrb[0].mxu0 %v76_v45 }
  0x36   :  { %891 = vmatpush3.bf16.msra.mxu0 %v974_v48  ;;  %676 = vmatmul.mubr.bf16.vlgmr.msra.gmra.mrb[0].mxu1 %v78_v49 }
  0x37   :  { %892 = vmatprep.subr.bf16.mxu0 %v976_v50  ;;  %913 = vmatpush3.bf16.msra.mxu1 %v975_v52 }
  0x38   :  { %914 = vmatprep.subr.bf16.mxu1 %v977_v53  ;;  %715 = vmatprep.mubr.bf16.mxu0 %v81_v22 }
  0x39   :  { %755 = vmatprep.mubr.bf16.mxu1 %v83_v25 }
  0x3a   :  { %893 = vmatpush3.bf16.msra.mxu0 %v978_v54 }
  0x3b   :  { %894 = vmatprep.subr.bf16.mxu0 %v980_v55  ;;  %915 = vmatpush3.bf16.msra.mxu1 %v979_v56 }
  0x3c   :  { %916 = vmatprep.subr.bf16.mxu1 %v981_v57 }
  0x3e   :  { %895 = vmatpush3.bf16.msra.mxu0 %v982_v58 }
  0x3f   :  { %896 = vmatprep.subr.bf16.mxu0 %v984_v59  ;;  %917 = vmatpush3.bf16.msra.mxu1 %v983_v60 }
  0x40   :  { %918 = vmatprep.subr.bf16.mxu1 %v985_v61 }
  0x42   :  { %897 = vmatpush3.bf16.msra.mxu0 %v986_v62 }
  0x43   :  { %898 = vmatprep.subr.bf16.mxu0 %v988_v63  ;;  %919 = vmatpush3.bf16.msra.mxu1 %v987_v0 }
  0x44   :  { %920 = vmatprep.subr.bf16.mxu1 %v989_v1 }
  0x46   :  { %899 = vmatpush3.bf16.msra.mxu0 %v990_v2 }
  0x47   :  { %900 = vmatprep.subr.bf16.mxu0 %v992_v3  ;;  %921 = vmatpush3.bf16.msra.mxu1 %v991_v4 }
  0x48   :  { %922 = vmatprep.subr.bf16.mxu1 %v993_v5 }
  0x4a   :  { %901 = vmatpush3.bf16.msra.mxu0 %v994_v6 }
  0x4b   :  { %902 = vmatprep.subr.bf16.mxu0 %v996_v7  ;;  %923 = vmatpush3.bf16.msra.mxu1 %v995_v8 }
  0x4c   :  { %924 = vmatprep.subr.bf16.mxu1 %v997_v9 }
  0x4e   :  { %903 = vmatpush3.bf16.msra.mxu0 %v998_v10 }
  0x4f   :  { %904 = vmatprep.subr.bf16.mxu0 %v1000_v11  ;;  %925 = vmatpush3.bf16.msra.mxu1 %v999_v12 }
  0x50   :  { %926 = vmatprep.subr.bf16.mxu1 %v1001_v13 }
  0x52   :  { %905 = vmatpush3.bf16.msra.mxu0 %v1002_v15 }
  0x53   :  { %927 = vmatpush3.bf16.msra.mxu1 %v1003_v18 }
  0x55   :  { %716 = vmatmul.mubr.bf16.vlgmr.msra.gmra.mrb[4].mxu0 %v80_v21 }
  0x56   :  { %756 = vmatmul.mubr.bf16.vlgmr.msra.gmra.mrb[4].mxu1 %v82_v24 }
 0x108   :  { %v862_v26 = vpop.f32.mrb[0].mxu0 }
 0x109   :  { %v863_v28 = vpop.f32.mrb[1].mxu0  ;;  %v884_v29 = vpop.f32.mrb[0].mxu1 }
 0x10a   :  { %v864_v30 = vadd.f32 %v863_v28, %v862_v26  ;;  %v865_v31 = vpop.f32.mrb[2].mxu0  ;;  %v885_v32 = vpop.f32.mrb[1].mxu1 }
 0x10b   :  { %v866_v33 = vpop.f32.mrb[3].mxu0  ;;  %v886_v35 = vadd.f32 %v885_v32, %v884_v29  ;;  %v887_v36 = vpop.f32.mrb[2].mxu1 }
 0x10c   :  { %v638_v34 = vadd.f32 %v864_v30, %v781_v27  ;;  %v888_v37 = vpop.f32.mrb[3].mxu1 }
 0x10e   :  { %v678_v38 = vadd.f32 %v886_v35, %v638_v34 }
 0x128   :  { %v906_v39 = vpop.f32.mrb[4].mxu0 }
 0x129   :  { %v907_v40 = vpop.f32.mrb[5].mxu0  ;;  %v928_v41 = vpop.f32.mrb[4].mxu1 }
 0x12a   :  { %v908_v42 = vadd.f32 %v907_v40, %v906_v39  ;;  %v909_v43 = vpop.f32.mrb[6].mxu0  ;;  %v929_v44 = vpop.f32.mrb[5].mxu1 }
 0x12b   :  { %v910_v45 = vpop.f32.mrb[7].mxu0  ;;  %v930_v47 = vadd.f32 %v929_v44, %v928_v41  ;;  %v931_v48 = vpop.f32.mrb[6].mxu1 }
 0x12c   :  { %v718_v46 = vadd.f32 %v908_v42, %v678_v38  ;;  %v932_v49 = vpop.f32.mrb[7].mxu1 }
 0x12e   :  { %v758_v50 = vadd.f32 %v930_v47, %v718_v46 }
 0x130   :  { %v763_v51 = vmax.f32 %v758_v50, 0.0 }
 0x132   :  { %765 = vst.msk [vmem:[#allocation5] sm:$0x3] %vm764_vm0, %v763_v51 }
 0x133   :  { %1038 = shalt.err (!%p1035_p12)
}
 0x134   :  { %s1039_s7 = scalar_lea.hbm %s1120_s3, 32 }
 0x135   :  { %p1040_p13 = scmp.ne.s32.totalorder %s1120_s3, %s1039_s7  ;;  %p1043_p0 = scmp.lt.u32.totalorder %s1039_s7, %s1120_s3 }
 0x137   :  { %p1045_p1 = pnand %p1043_p0, %p1040_p13 }
 0x139   :  { %1048 = shalt.err (!%p1045_p1)
}
 0x13a   :  { %775 = dma.vmem_to_hbm [thread:$0]  %s773_s30, 32, %s1120_s3, [#allocation4]  }
 0x13b   :  { %1051 = dma.done.wait [#allocation4], 32  }
 0x13c   :  { %1052 = vsyncadd [#allocation4], 4294967264 }
 0x13d   :  { %779 = vsyncpa [#allocation3], 1 }
 0x13e   :  { %780 = vsyncpa [#allocation4], 1 }

</bundles_post_ra>
